<compile_context>
chip_gen: v6e
topology: v6e:2x2x1
jax: 0.10.0
libtpu: 0.0.40
codegen_flags: <defaults>
</compile_context>

<pallas_src>
import functools

import jax
import jax.numpy as jnp
from jax import lax
from jax.experimental import pallas as pl
from jax.experimental.pallas import tpu as pltpu

EPS = 1e-7       # numerical clamp for norms / arccosh
LN_EPS = 1e-5    # nn.LayerNorm default eps


def _hnn_kernel(xt_ref, w_ref, b_ref, g_ref, be_ref, o_ref, *, dot_in_bf16):
    x = xt_ref[...].astype(jnp.float32)       # (Din, TM)   Lorentz points (transposed)
    w = w_ref[...].astype(jnp.float32)        # (Dout, Din) weight, row0/col0 zeroed
    b = b_ref[...].astype(jnp.float32)        # (Dout, 1)   bias,      row0 zeroed
    gamma = g_ref[...].astype(jnp.float32)    # (Dout, 1)   LN weight, row0 zeroed
    beta = be_ref[...].astype(jnp.float32)    # (Dout, 1)   LN bias,   row0 zeroed

    dout = w.shape[0]
    inv_nsp = 1.0 / float(dout - 1)
    eps2 = EPS * EPS

    # Time / spatial masks on the output-coordinate (sublane) axis; cheap VPU.
    row = lax.broadcasted_iota(jnp.int32, (dout, 1), 0)
    sp = (row > 0).astype(jnp.float32)        # spatial coordinates
    t0 = 1.0 - sp                             # time coordinate

    def arccosh(p0):
        p0c = jnp.maximum(p0, 1.0 + EPS)
        return jnp.log(p0c + jnp.sqrt(p0c * p0c - 1.0))

    def cosh_sinh(t):
        # Exact exp(-t): avoids the 0.5*(e - approx(1/e)) cancellation that
        # amplified vrcp error for small t (review correctness note).  All
        # EUP work here runs on (1, TM) lane rows, so it is cheap.
        e = jnp.exp(t)
        em = jnp.exp(-t)
        return 0.5 * (e + em), 0.5 * (e - em)

    # ---- HypLinear -------------------------------------------------------
    # logmap0(x): u_s = arccosh(x0)/||x_s|| * x_s, u_0 = 0.  W has column 0
    # zeroed (kills the zero time input coordinate) and row 0 zeroed
    # (realizes proj_tan0 on the output), so no per-element masking is needed
    # and the per-node scale factors out of the matmul.
    x0 = x[0:1, :]                                                  # (1, TM)
    xsq = jnp.sum(x * x, axis=0, keepdims=True) - x0 * x0          # ||x_s||^2
    u_scale = arccosh(x0) * lax.rsqrt(jnp.maximum(xsq, eps2))      # (1, TM)
    if dot_in_bf16:
        prod = jnp.dot(w.astype(jnp.bfloat16), x.astype(jnp.bfloat16),
                       preferred_element_type=jnp.float32)
    else:
        prod = jnp.dot(w, x, preferred_element_type=jnp.float32)   # (Dout, TM)
    v = u_scale * prod

    # expmap0: h = (cosh|v|, sinh|v|/|v| * v_s); note h0 == cosh|v| == c.
    vsq = jnp.sum(v * v, axis=0, keepdims=True)
    inv_nv = lax.rsqrt(jnp.maximum(vsq, eps2))
    c, s = cosh_sinh(vsq * inv_nv)
    h = t0 * c + (s * inv_nv) * v

    # bias: pt = transp0(h, b); xb = expmap_h(pt).  b is tangent (b0 == 0);
    # pt0 == inner and h0 == c, so the Lorentz norm is maskless.
    inner = jnp.sum(h * b, axis=0, keepdims=True)                   # <h_s, b_s>
    pt = b + (inner / (1.0 + c)) * (h + t0)
    ptsq = jnp.maximum(
        jnp.sum(pt * pt, axis=0, keepdims=True) - 2.0 * inner * inner, 0.0)
    inv_npt = lax.rsqrt(jnp.maximum(ptsq, eps2))
    cb, sb = cosh_sinh(ptsq * inv_npt)
    xb = cb * h + (sb * inv_npt) * pt

    # ---- HypNorm: LayerNorm on the spatial coords of logmap0(xb) ----------
    xbs = xb * sp
    bsq = jnp.sum(xbs * xbs, axis=0, keepdims=True)
    t = (arccosh(xb[0:1, :]) * lax.rsqrt(jnp.maximum(bsq, eps2))) * xbs
    mean = jnp.sum(t, axis=0, keepdims=True) * inv_nsp              # t[0] == 0
    diff = (t - mean) * sp
    var = jnp.sum(diff * diff, axis=0, keepdims=True) * inv_nsp
    t2 = diff * lax.rsqrt(var + LN_EPS) * gamma + beta              # t2[0] == 0

    # ---- HypAct: ReLU in the tangent space at the origin -------------------
    # logmap0(expmap0(t2)) == t2 for zero-time tangent vectors, so the
    # exp/log round trip of the original module is elided.
    a = jnp.maximum(t2, 0.0)
    asq = jnp.sum(a * a, axis=0, keepdims=True)
    inv_na = lax.rsqrt(jnp.maximum(asq, eps2))
    ca, sa = cosh_sinh(asq * inv_na)
    o_ref[...] = (t0 * ca + (sa * inv_na) * a).astype(o_ref.dtype)


def _round_up(a, b):
    return (a + b - 1) // b * b


def hnn_layer(x, w, bias, gamma, beta, *, tm=None,
              tile_budget=20 * 1024 * 1024,
              vmem_limit_bytes=48 * 1024 * 1024,
              dot_in_bf16=False):
    """HNNLayer forward.

    x:     (N, Din)   Lorentz points (coordinate 0 = time coordinate).
    w:     (Dout, Din) weight of nn.Linear(Din, Dout, bias=False).
    bias:  (1, Dout)  HypLinear bias (time slot killed by proj_tan0).
    gamma: (1, Dout)  LayerNorm weight with an unused time slot at index 0.
    beta:  (1, Dout)  LayerNorm bias  with an unused time slot at index 0.
    dot_in_bf16: cast matmul operands to bf16 (native MXU rate) for large
    Din*Dout; keep False for small layers / v5e strict-precision runs.
    """
    x = jnp.asarray(x)
    w = jnp.asarray(w)
    n, din = x.shape
    dout = w.shape[0]

    # Fold the structural masking into the (tiny) parameters on the host:
    #  - w col 0 = 0: kills the (zero) time input coordinate of logmap0(x),
    #  - w row 0 / bias / gamma / beta time slot = 0: implements proj_tan0 on
    #    the output tangent vectors -> no per-element masks inside the kernel.
    w_z = w.at[0, :].set(0.0).at[:, 0].set(0.0)
    b_t = jnp.asarray(bias).reshape(1, dout).T.at[0, :].set(0.0)     # (Dout, 1)
    g_t = jnp.asarray(gamma).reshape(1, dout).T.at[0, :].set(0.0)
    be_t = jnp.asarray(beta).reshape(1, dout).T.at[0, :].set(0.0)

    # --- node-tile (lane) size --------------------------------------------
    # Corrected VMEM bookkeeping (perf review): Din/Dout sit on the sublane
    # axis -> pad to multiples of 8 (TM, the lane axis, is already a multiple
    # of 128), and count ~10 live (Dout, TM) f32 intermediates (v, h, pt, xb,
    # xbs, t, diff, t2, a + temps) on top of the double-buffered I/O tiles.
    # A ~20 MiB TM-dependent budget stays safely inside v7x's 64 MiB VMEM;
    # on v5e/v6e (128 MiB) callers may raise tile_budget / vmem_limit_bytes.
    din_sub = _round_up(din, 8)
    dout_sub = _round_up(dout, 8)
    n_live_intermediates = 10
    per_col_bytes = 4 * (2 * din_sub + (2 + n_live_intermediates) * dout_sub)
    if tm is None:
        tm = (tile_budget // per_col_bytes) // 128 * 128
    tm = max(128, (tm // 128) * 128)
    tm = min(tm, _round_up(n, 128))            # don't over-pad tiny N
    if n > 128:
        # Force >=2 grid steps when N allows so the "parallel" axis can be
        # sharded across both TensorCores on v7x.
        tm = min(tm, _round_up(pl.cdiv(n, 2), 128))
    n_pad = _round_up(n, tm)

    # Host-side layout plumbing: the nodes-on-lanes layout needs x^T anyway;
    # the tail padding (Lorentz-origin columns) is folded into that single
    # copy rather than a separate full-array pad of the original x.
    xt = x.T                                                          # (Din, N)
    if n_pad != n:
        pad = jnp.zeros((din, n_pad - n), x.dtype).at[0, :].set(1.0)
        xt = jnp.concatenate([xt, pad], axis=1)

    kernel = functools.partial(_hnn_kernel, dot_in_bf16=dot_in_bf16)
    out_t = pl.pallas_call(
        kernel,
        out_shape=jax.ShapeDtypeStruct((dout, n_pad), x.dtype),
        grid=(n_pad // tm,),
        in_specs=[
            pl.BlockSpec((din, tm), lambda i: (0, i)),
            pl.BlockSpec((dout, din), lambda i: (0, 0)),
            pl.BlockSpec((dout, 1), lambda i: (0, 0)),
            pl.BlockSpec((dout, 1), lambda i: (0, 0)),
            pl.BlockSpec((dout, 1), lambda i: (0, 0)),
        ],
        out_specs=pl.BlockSpec((dout, tm), lambda i: (0, i)),
        compiler_params=pltpu.CompilerParams(
            dimension_semantics=("parallel",),
            vmem_limit_bytes=vmem_limit_bytes),
    )(xt, w_z, b_t, g_t, be_t)
    return out_t[:, :n].T


def reference(x, w, bias, gamma, beta):
    """Pure-JAX reference of the PyTorch forward pass (for verification)."""
    def logmap0(p):
        p0 = jnp.maximum(p[:, :1], 1.0 + EPS)
        ps = p[:, 1:]
        ns = jnp.maximum(jnp.linalg.norm(ps, axis=-1, keepdims=True), EPS)
        theta = jnp.log(p0 + jnp.sqrt(p0 * p0 - 1.0))
        return jnp.concatenate([jnp.zeros_like(p0), theta / ns * ps], axis=-1)

    def expmap0(u):
        us = u[:, 1:]
        nu = jnp.linalg.norm(us, axis=-1, keepdims=True)
        return jnp.concatenate(
            [jnp.cosh(nu), jnp.sinh(nu) / jnp.maximum(nu, EPS) * us], axis=-1)

    u = logmap0(x)
    v = u @ w.T
    v = v.at[:, :1].set(0.0)
    h = expmap0(v)
    bt = bias.at[:, :1].set(0.0)
    inner = jnp.sum(h[:, 1:] * bt[:, 1:], -1, keepdims=True)
    oh = jnp.concatenate([1.0 + h[:, :1], h[:, 1:]], axis=-1)
    pt = bt + inner / (1.0 + h[:, :1]) * oh
    ptn = jnp.sqrt(jnp.maximum(
        jnp.sum(pt[:, 1:] ** 2, -1, keepdims=True) - pt[:, :1] ** 2, 0.0))
    xb = jnp.cosh(ptn) * h + jnp.sinh(ptn) / jnp.maximum(ptn, EPS) * pt
    t = logmap0(xb)
    ts = t[:, 1:]
    mean = jnp.mean(ts, -1, keepdims=True)
    var = jnp.mean((ts - mean) ** 2, -1, keepdims=True)
    tn = (ts - mean) / jnp.sqrt(var + LN_EPS) * gamma[:, 1:] + beta[:, 1:]
    t = jnp.concatenate([t[:, :1], tn], axis=-1)
    h2 = expmap0(t)
    a = jnp.maximum(logmap0(h2), 0.0)
    a = a.at[:, :1].set(0.0)
    return expmap0(a)


if __name__ == "__main__":
    N, Din, Dout = 300, 8, 16          # N deliberately not a tile multiple
    key = jax.random.PRNGKey(0)
    k1, k2, k3 = jax.random.split(key, 3)

    # Valid Lorentz points (k=1): x0 = sqrt(1 + ||x_spatial||^2)
    xs = 0.5 * jax.random.normal(k1, (N, Din - 1), jnp.float32)
    x0 = jnp.sqrt(1.0 + jnp.sum(xs * xs, axis=-1, keepdims=True))
    x = jnp.concatenate([x0, xs], axis=-1)

    # nn.Linear(in_dim, out_dim, bias=False): weight (Dout, Din)
    bound = 1.0 / (Din ** 0.5)
    w = jax.random.uniform(k2, (Dout, Din), jnp.float32, -bound, bound)
    # Module init has bias == 0; use a small non-zero bias so the
    # transp0/expmap bias path is actually exercised and verified.
    bias = 0.1 * jax.random.normal(k3, (1, Dout), jnp.float32)
    gamma = jnp.ones((1, Dout), jnp.float32)           # LN weight (slot 0 unused)
    beta = jnp.zeros((1, Dout), jnp.float32)           # LN bias   (slot 0 unused)

    ref = reference(x, w, bias, gamma, beta)

    # Forced small tile: exercises a 3-step grid plus tail padding.
    out_small = jax.block_until_ready(
        hnn_layer(x, w, bias, gamma, beta, tm=128))
    # Default (auto-budgeted) tile path: picks tm=256 -> 2 parallel steps.
    out = jax.block_until_ready(hnn_layer(x, w, bias, gamma, beta))

    for o in (out_small, out):
        assert o.shape == (N, Dout) and o.dtype == jnp.float32
        assert bool(jnp.all(jnp.isfinite(o)))
        # The elided expmap0/logmap0 round trip (an exact identity, but with
        # different eps clamps) leaves a small drift vs. the literal reference.
        assert jnp.allclose(o, ref, rtol=1e-2, atol=2e-3), (
            float(jnp.max(jnp.abs(o - ref))))
    print("KERNEL_OK")
</pallas_src>

<mosaic_0001>
module attributes {stable_mosaic.version = 11 : i64} {
  func.func @_hnn_kernel(%arg0: i32, %arg1: memref<8x128xf32, #tpu.memory_space<vmem>>, %arg2: memref<16x8xf32, #tpu.memory_space<vmem>>, %arg3: memref<16x1xf32, #tpu.memory_space<vmem>>, %arg4: memref<16x1xf32, #tpu.memory_space<vmem>>, %arg5: memref<16x1xf32, #tpu.memory_space<vmem>>, %arg6: memref<16x128xf32, #tpu.memory_space<vmem>>) attributes {dimension_semantics = [#tpu.dimension_semantics<parallel>], iteration_bounds = array<i64: 3>, scalar_prefetch = 0 : i64, scratch_operands = 0 : i64, tpu.core_type = #tpu.core_type<tc>, window_params = [{transform_indices = @transform_0, window_bounds = array<i64: 8, 128>}, {pipeline_mode = #tpu.pipeline_mode<synchronous>, transform_indices = @transform_1, window_bounds = array<i64: 16, 8>}, {pipeline_mode = #tpu.pipeline_mode<synchronous>, transform_indices = @transform_2, window_bounds = array<i64: 16, 1>}, {pipeline_mode = #tpu.pipeline_mode<synchronous>, transform_indices = @transform_3, window_bounds = array<i64: 16, 1>}, {pipeline_mode = #tpu.pipeline_mode<synchronous>, transform_indices = @transform_4, window_bounds = array<i64: 16, 1>}, {transform_indices = @transform_5, window_bounds = array<i64: 16, 128>}]} {
    %c0 = arith.constant 0 : index
    %c0_0 = arith.constant 0 : index
    %0 = vector.load %arg1[%c0, %c0_0] : memref<8x128xf32, #tpu.memory_space<vmem>>, vector<8x128xf32>
    %c0_1 = arith.constant 0 : index
    %c0_2 = arith.constant 0 : index
    %1 = vector.load %arg2[%c0_1, %c0_2] : memref<16x8xf32, #tpu.memory_space<vmem>>, vector<16x8xf32>
    %c0_3 = arith.constant 0 : index
    %c0_4 = arith.constant 0 : index
    %2 = vector.load %arg3[%c0_3, %c0_4] : memref<16x1xf32, #tpu.memory_space<vmem>>, vector<16x1xf32>
    %c0_5 = arith.constant 0 : index
    %c0_6 = arith.constant 0 : index
    %3 = vector.load %arg4[%c0_5, %c0_6] : memref<16x1xf32, #tpu.memory_space<vmem>>, vector<16x1xf32>
    %c0_7 = arith.constant 0 : index
    %c0_8 = arith.constant 0 : index
    %4 = vector.load %arg5[%c0_7, %c0_8] : memref<16x1xf32, #tpu.memory_space<vmem>>, vector<16x1xf32>
    %5 = tpu.iota {dimensions = array<i32: 0>} : vector<16x1xi32>
    %c0_i32 = arith.constant 0 : i32
    %6 = vector.broadcast %c0_i32 : i32 to vector<16x1xi32>
    %7 = arith.cmpi sgt, %5, %6 : vector<16x1xi32>
    %8 = arith.extui %7 : vector<16x1xi1> to vector<16x1xi32>
    %9 = arith.sitofp %8 : vector<16x1xi32> to vector<16x1xf32>
    %cst = arith.constant 1.000000e+00 : f32
    %10 = vector.broadcast %cst : f32 to vector<16x1xf32>
    %11 = arith.subf %10, %9 : vector<16x1xf32>
    %12 = vector.extract_strided_slice %0 {offsets = [0, 0], sizes = [1, 128], strides = [1, 1]} : vector<8x128xf32> to vector<1x128xf32>
    %13 = arith.mulf %0, %0 : vector<8x128xf32>
    %cst_9 = arith.constant dense<0.000000e+00> : vector<128xf32>
    %14 = vector.multi_reduction <add>, %13, %cst_9 [0] : vector<8x128xf32> to vector<128xf32>
    %15 = vector.shape_cast %14 : vector<128xf32> to vector<1x128xf32>
    %16 = arith.mulf %12, %12 : vector<1x128xf32>
    %17 = arith.subf %15, %16 : vector<1x128xf32>
    %cst_10 = arith.constant 1.00000012 : f32
    %18 = vector.broadcast %cst_10 : f32 to vector<1x128xf32>
    %19 = arith.maximumf %12, %18 : vector<1x128xf32>
    %20 = arith.mulf %19, %19 : vector<1x128xf32>
    %cst_11 = arith.constant 1.000000e+00 : f32
    %21 = vector.broadcast %cst_11 : f32 to vector<1x128xf32>
    %22 = arith.subf %20, %21 : vector<1x128xf32>
    %23 = math.sqrt %22 : vector<1x128xf32>
    %24 = arith.addf %19, %23 : vector<1x128xf32>
    %25 = math.log %24 : vector<1x128xf32>
    %cst_12 = arith.constant 9.99999982E-15 : f32
    %26 = vector.broadcast %cst_12 : f32 to vector<1x128xf32>
    %27 = arith.maximumf %17, %26 : vector<1x128xf32>
    %28 = math.rsqrt %27 : vector<1x128xf32>
    %29 = arith.mulf %25, %28 : vector<1x128xf32>
    %cst_13 = arith.constant dense<0.000000e+00> : vector<16x128xf32>
    %30 = tpu.matmul %1, %0, %cst_13 {dimension_numbers = #tpu.dot_dimension_numbers<[1], [0], [0], [1], [0, 0, 1, 1], [], []>} : vector<16x8xf32>, vector<8x128xf32>, vector<16x128xf32> -> vector<16x128xf32>
    %31 = vector.broadcast %29 : vector<1x128xf32> to vector<16x128xf32>
    %32 = arith.mulf %31, %30 : vector<16x128xf32>
    %33 = arith.mulf %32, %32 : vector<16x128xf32>
    %cst_14 = arith.constant dense<0.000000e+00> : vector<128xf32>
    %34 = vector.multi_reduction <add>, %33, %cst_14 [0] : vector<16x128xf32> to vector<128xf32>
    %35 = vector.shape_cast %34 : vector<128xf32> to vector<1x128xf32>
    %cst_15 = arith.constant 9.99999982E-15 : f32
    %36 = vector.broadcast %cst_15 : f32 to vector<1x128xf32>
    %37 = arith.maximumf %35, %36 : vector<1x128xf32>
    %38 = math.rsqrt %37 : vector<1x128xf32>
    %39 = arith.mulf %35, %38 : vector<1x128xf32>
    %40 = math.exp %39 : vector<1x128xf32>
    %cst_16 = arith.constant 0.000000e+00 : f32
    %41 = vector.broadcast %cst_16 : f32 to vector<1x128xf32>
    %42 = arith.subf %41, %39 : vector<1x128xf32>
    %43 = math.exp %42 : vector<1x128xf32>
    %44 = arith.addf %40, %43 : vector<1x128xf32>
    %cst_17 = arith.constant 5.000000e-01 : f32
    %45 = vector.broadcast %cst_17 : f32 to vector<1x128xf32>
    %46 = arith.mulf %45, %44 : vector<1x128xf32>
    %47 = arith.subf %40, %43 : vector<1x128xf32>
    %cst_18 = arith.constant 5.000000e-01 : f32
    %48 = vector.broadcast %cst_18 : f32 to vector<1x128xf32>
    %49 = arith.mulf %48, %47 : vector<1x128xf32>
    %50 = vector.broadcast %11 : vector<16x1xf32> to vector<16x128xf32>
    %51 = vector.broadcast %46 : vector<1x128xf32> to vector<16x128xf32>
    %52 = arith.mulf %50, %51 : vector<16x128xf32>
    %53 = arith.mulf %49, %38 : vector<1x128xf32>
    %54 = vector.broadcast %53 : vector<1x128xf32> to vector<16x128xf32>
    %55 = arith.mulf %54, %32 : vector<16x128xf32>
    %56 = arith.addf %52, %55 : vector<16x128xf32>
    %57 = vector.broadcast %2 : vector<16x1xf32> to vector<16x128xf32>
    %58 = arith.mulf %56, %57 : vector<16x128xf32>
    %cst_19 = arith.constant dense<0.000000e+00> : vector<128xf32>
    %59 = vector.multi_reduction <add>, %58, %cst_19 [0] : vector<16x128xf32> to vector<128xf32>
    %60 = vector.shape_cast %59 : vector<128xf32> to vector<1x128xf32>
    %cst_20 = arith.constant 1.000000e+00 : f32
    %61 = vector.broadcast %cst_20 : f32 to vector<1x128xf32>
    %62 = arith.addf %61, %46 : vector<1x128xf32>
    %63 = arith.divf %60, %62 : vector<1x128xf32>
    %64 = vector.broadcast %11 : vector<16x1xf32> to vector<16x128xf32>
    %65 = arith.addf %56, %64 : vector<16x128xf32>
    %66 = vector.broadcast %63 : vector<1x128xf32> to vector<16x128xf32>
    %67 = arith.mulf %66, %65 : vector<16x128xf32>
    %68 = vector.broadcast %2 : vector<16x1xf32> to vector<16x128xf32>
    %69 = arith.addf %68, %67 : vector<16x128xf32>
    %70 = arith.mulf %69, %69 : vector<16x128xf32>
    %cst_21 = arith.constant dense<0.000000e+00> : vector<128xf32>
    %71 = vector.multi_reduction <add>, %70, %cst_21 [0] : vector<16x128xf32> to vector<128xf32>
    %72 = vector.shape_cast %71 : vector<128xf32> to vector<1x128xf32>
    %cst_22 = arith.constant 2.000000e+00 : f32
    %73 = vector.broadcast %cst_22 : f32 to vector<1x128xf32>
    %74 = arith.mulf %73, %60 : vector<1x128xf32>
    %75 = arith.mulf %74, %60 : vector<1x128xf32>
    %76 = arith.subf %72, %75 : vector<1x128xf32>
    %cst_23 = arith.constant 0.000000e+00 : f32
    %77 = vector.broadcast %cst_23 : f32 to vector<1x128xf32>
    %78 = arith.maximumf %76, %77 : vector<1x128xf32>
    %cst_24 = arith.constant 9.99999982E-15 : f32
    %79 = vector.broadcast %cst_24 : f32 to vector<1x128xf32>
    %80 = arith.maximumf %78, %79 : vector<1x128xf32>
    %81 = math.rsqrt %80 : vector<1x128xf32>
    %82 = arith.mulf %78, %81 : vector<1x128xf32>
    %83 = math.exp %82 : vector<1x128xf32>
    %cst_25 = arith.constant 0.000000e+00 : f32
    %84 = vector.broadcast %cst_25 : f32 to vector<1x128xf32>
    %85 = arith.subf %84, %82 : vector<1x128xf32>
    %86 = math.exp %85 : vector<1x128xf32>
    %87 = arith.addf %83, %86 : vector<1x128xf32>
    %cst_26 = arith.constant 5.000000e-01 : f32
    %88 = vector.broadcast %cst_26 : f32 to vector<1x128xf32>
    %89 = arith.mulf %88, %87 : vector<1x128xf32>
    %90 = arith.subf %83, %86 : vector<1x128xf32>
    %cst_27 = arith.constant 5.000000e-01 : f32
    %91 = vector.broadcast %cst_27 : f32 to vector<1x128xf32>
    %92 = arith.mulf %91, %90 : vector<1x128xf32>
    %93 = vector.broadcast %89 : vector<1x128xf32> to vector<16x128xf32>
    %94 = arith.mulf %93, %56 : vector<16x128xf32>
    %95 = arith.mulf %92, %81 : vector<1x128xf32>
    %96 = vector.broadcast %95 : vector<1x128xf32> to vector<16x128xf32>
    %97 = arith.mulf %96, %69 : vector<16x128xf32>
    %98 = arith.addf %94, %97 : vector<16x128xf32>
    %99 = vector.broadcast %9 : vector<16x1xf32> to vector<16x128xf32>
    %100 = arith.mulf %98, %99 : vector<16x128xf32>
    %101 = arith.mulf %100, %100 : vector<16x128xf32>
    %cst_28 = arith.constant dense<0.000000e+00> : vector<128xf32>
    %102 = vector.multi_reduction <add>, %101, %cst_28 [0] : vector<16x128xf32> to vector<128xf32>
    %103 = vector.shape_cast %102 : vector<128xf32> to vector<1x128xf32>
    %104 = vector.extract_strided_slice %98 {offsets = [0, 0], sizes = [1, 128], strides = [1, 1]} : vector<16x128xf32> to vector<1x128xf32>
    %cst_29 = arith.constant 1.00000012 : f32
    %105 = vector.broadcast %cst_29 : f32 to vector<1x128xf32>
    %106 = arith.maximumf %104, %105 : vector<1x128xf32>
    %107 = arith.mulf %106, %106 : vector<1x128xf32>
    %cst_30 = arith.constant 1.000000e+00 : f32
    %108 = vector.broadcast %cst_30 : f32 to vector<1x128xf32>
    %109 = arith.subf %107, %108 : vector<1x128xf32>
    %110 = math.sqrt %109 : vector<1x128xf32>
    %111 = arith.addf %106, %110 : vector<1x128xf32>
    %112 = math.log %111 : vector<1x128xf32>
    %cst_31 = arith.constant 9.99999982E-15 : f32
    %113 = vector.broadcast %cst_31 : f32 to vector<1x128xf32>
    %114 = arith.maximumf %103, %113 : vector<1x128xf32>
    %115 = math.rsqrt %114 : vector<1x128xf32>
    %116 = arith.mulf %112, %115 : vector<1x128xf32>
    %117 = vector.broadcast %116 : vector<1x128xf32> to vector<16x128xf32>
    %118 = arith.mulf %117, %100 : vector<16x128xf32>
    %cst_32 = arith.constant dense<0.000000e+00> : vector<128xf32>
    %119 = vector.multi_reduction <add>, %118, %cst_32 [0] : vector<16x128xf32> to vector<128xf32>
    %120 = vector.shape_cast %119 : vector<128xf32> to vector<1x128xf32>
    %cst_33 = arith.constant 0.0666666701 : f32
    %121 = vector.broadcast %cst_33 : f32 to vector<1x128xf32>
    %122 = arith.mulf %120, %121 : vector<1x128xf32>
    %123 = vector.broadcast %122 : vector<1x128xf32> to vector<16x128xf32>
    %124 = arith.subf %118, %123 : vector<16x128xf32>
    %125 = vector.broadcast %9 : vector<16x1xf32> to vector<16x128xf32>
    %126 = arith.mulf %124, %125 : vector<16x128xf32>
    %127 = arith.mulf %126, %126 : vector<16x128xf32>
    %cst_34 = arith.constant dense<0.000000e+00> : vector<128xf32>
    %128 = vector.multi_reduction <add>, %127, %cst_34 [0] : vector<16x128xf32> to vector<128xf32>
    %129 = vector.shape_cast %128 : vector<128xf32> to vector<1x128xf32>
    %cst_35 = arith.constant 0.0666666701 : f32
    %130 = vector.broadcast %cst_35 : f32 to vector<1x128xf32>
    %131 = arith.mulf %129, %130 : vector<1x128xf32>
    %cst_36 = arith.constant 9.99999974E-6 : f32
    %132 = vector.broadcast %cst_36 : f32 to vector<1x128xf32>
    %133 = arith.addf %131, %132 : vector<1x128xf32>
    %134 = math.rsqrt %133 : vector<1x128xf32>
    %135 = vector.broadcast %134 : vector<1x128xf32> to vector<16x128xf32>
    %136 = arith.mulf %126, %135 : vector<16x128xf32>
    %137 = vector.broadcast %3 : vector<16x1xf32> to vector<16x128xf32>
    %138 = arith.mulf %136, %137 : vector<16x128xf32>
    %139 = vector.broadcast %4 : vector<16x1xf32> to vector<16x128xf32>
    %140 = arith.addf %138, %139 : vector<16x128xf32>
    %cst_37 = arith.constant 0.000000e+00 : f32
    %141 = vector.broadcast %cst_37 : f32 to vector<16x128xf32>
    %142 = arith.maximumf %140, %141 : vector<16x128xf32>
    %143 = arith.mulf %142, %142 : vector<16x128xf32>
    %cst_38 = arith.constant dense<0.000000e+00> : vector<128xf32>
    %144 = vector.multi_reduction <add>, %143, %cst_38 [0] : vector<16x128xf32> to vector<128xf32>
    %145 = vector.shape_cast %144 : vector<128xf32> to vector<1x128xf32>
    %cst_39 = arith.constant 9.99999982E-15 : f32
    %146 = vector.broadcast %cst_39 : f32 to vector<1x128xf32>
    %147 = arith.maximumf %145, %146 : vector<1x128xf32>
    %148 = math.rsqrt %147 : vector<1x128xf32>
    %149 = arith.mulf %145, %148 : vector<1x128xf32>
    %150 = math.exp %149 : vector<1x128xf32>
    %cst_40 = arith.constant 0.000000e+00 : f32
    %151 = vector.broadcast %cst_40 : f32 to vector<1x128xf32>
    %152 = arith.subf %151, %149 : vector<1x128xf32>
    %153 = math.exp %152 : vector<1x128xf32>
    %154 = arith.addf %150, %153 : vector<1x128xf32>
    %cst_41 = arith.constant 5.000000e-01 : f32
    %155 = vector.broadcast %cst_41 : f32 to vector<1x128xf32>
    %156 = arith.mulf %155, %154 : vector<1x128xf32>
    %157 = arith.subf %150, %153 : vector<1x128xf32>
    %cst_42 = arith.constant 5.000000e-01 : f32
    %158 = vector.broadcast %cst_42 : f32 to vector<1x128xf32>
    %159 = arith.mulf %158, %157 : vector<1x128xf32>
    %160 = vector.broadcast %11 : vector<16x1xf32> to vector<16x128xf32>
    %161 = vector.broadcast %156 : vector<1x128xf32> to vector<16x128xf32>
    %162 = arith.mulf %160, %161 : vector<16x128xf32>
    %163 = arith.mulf %159, %148 : vector<1x128xf32>
    %164 = vector.broadcast %163 : vector<1x128xf32> to vector<16x128xf32>
    %165 = arith.mulf %164, %142 : vector<16x128xf32>
    %166 = arith.addf %162, %165 : vector<16x128xf32>
    %c0_43 = arith.constant 0 : index
    %c0_44 = arith.constant 0 : index
    %167 = vector.load %arg6[%c0_43, %c0_44] : memref<16x128xf32, #tpu.memory_space<vmem>>, vector<16x128xf32>
    tpu.vector_store %arg6[%c0_43, %c0_44], %166 {strides = array<i32>} : memref<16x128xf32, #tpu.memory_space<vmem>>, vector<16x128xf32>,
    return
  }
  func.func @transform_0(%arg0: i32) -> (i32, i32) {
    %c0_i32 = arith.constant 0 : i32
    %c0_i32_0 = arith.constant 0 : i32
    return %c0_i32, %arg0 : i32, i32
  }
  func.func @transform_1(%arg0: i32) -> (i32, i32) {
    %c0_i32 = arith.constant 0 : i32
    %c0_i32_0 = arith.constant 0 : i32
    %c0_i32_1 = arith.constant 0 : i32
    return %c0_i32, %c0_i32_0 : i32, i32
  }
  func.func @transform_2(%arg0: i32) -> (i32, i32) {
    %c0_i32 = arith.constant 0 : i32
    %c0_i32_0 = arith.constant 0 : i32
    %c0_i32_1 = arith.constant 0 : i32
    return %c0_i32, %c0_i32_0 : i32, i32
  }
  func.func @transform_3(%arg0: i32) -> (i32, i32) {
    %c0_i32 = arith.constant 0 : i32
    %c0_i32_0 = arith.constant 0 : i32
    %c0_i32_1 = arith.constant 0 : i32
    return %c0_i32, %c0_i32_0 : i32, i32
  }
  func.func @transform_4(%arg0: i32) -> (i32, i32) {
    %c0_i32 = arith.constant 0 : i32
    %c0_i32_0 = arith.constant 0 : i32
    %c0_i32_1 = arith.constant 0 : i32
    return %c0_i32, %c0_i32_0 : i32, i32
  }
  func.func @transform_5(%arg0: i32) -> (i32, i32) {
    %c0_i32 = arith.constant 0 : i32
    %c0_i32_0 = arith.constant 0 : i32
    return %c0_i32, %arg0 : i32, i32
  }
}

</mosaic_0001>

<bundles_post_ra>
// kernel: tpu_custom_call.1
= control target key start
LH: loop header
LB: loop body
LE: loop exit
PB: predicated region body
PF: predicated region fallthrough
CT: control target
= control target key end

     0   :  { %10 = vsyncpa [#allocation3], 0  ;;  %s977_s0 = inlined_call_operand.vmem [shape: f32[8,384], index: 0, kind: input, shape index: {}]   ;;  %s978_s1 = inlined_call_operand.vmem [shape: f32[16,8], index: 1, kind: input, shape index: {}]   ;;  %s979_s2 = inlined_call_operand.vmem [shape: f32[16,1], index: 2, kind: input, shape index: {}]   ;;  %s980_s3 = inlined_call_operand.vmem [shape: f32[16,1], index: 3, kind: input, shape index: {}]   ;;  %s981_s4 = inlined_call_operand.vmem [shape: f32[16,1], index: 4, kind: input, shape index: {}]   ;;  %s982_s5 = inlined_call_operand.hbm [shape: f32[16,384], index: 5, kind: output, shape index: {}]  }
   0x1   :  { %12 = vsyncpa [#allocation3 + $0x1], 0  ;;  %s831_s18 = smov 0   ;;  %s833_s19 = smov 0  }
   0x2   :  { %s835_s20 = smov 0   ;;  %s837_s21 = smov 0  }
   0x3 LB: > { %s852_s22 = sadd.s32 4294967295, %s793_s21   ;;  %s630_s23 = sadd.s32 4294967294, %s793_s21   ;;  %s793_s21 = sphi %s837_s21, %s988_s21   ;;  %s789_s20 = sphi %s835_s20, %s987_s20   ;;  %s785_s19 = sphi %s833_s19, %s986_s19   ;;  %s781_s18 = sphi %s831_s18, %s985_s18  }
   0x4   : > { %s856_s24 = sadd.s32 1, %s793_s21   ;;  %s135_s25 = sadd.s32 1, %s789_s20 }
   0x5   : > { %s132_s26 = ssub.s32 %s793_s21, %s856_s24  ;;  %p145_p0 = scmp.ne.s32.totalorder %s789_s20, %s785_s19 }
   0x6   : > { %p133_p1 = scmp.eq.s32.totalorder %s132_s26, 0  ;;  %p146_p2 = scmp.eq.s32.totalorder %s852_s22, 2 }
   0x7   : > { %p151_p3 = scmp.ne.s32.totalorder %s785_s19, %s781_s18  ;;  %p152_p4 = scmp.eq.s32.totalorder %s630_s23, 2 }
   0x8   : > { %s867_s27 = scalar_select %p133_p1, %s789_s20, %s135_s25  }
   0x9   : > { %p869_p5 = por %p146_p2, %p145_p0  ;;  %p873_p6 = por %p152_p4, %p151_p3 }
   0xa   : > { %p633_p7 = scmp.ge.s32.totalorder %s793_s21, 1  ;;  %p189_p8 = scmp.lt.s32.totalorder %s793_s21, 4 }
   0xc   : > { %p190_p9 = pnand %p633_p7, %p189_p8 }
   0xd   : > { %p216_p10 = scmp.lt.s32.totalorder (!%p190_p9), %s852_s22, 2  ;;  %s213_s10 = sand.u32 (!%p190_p9), 1, %s785_s19  }
   0xe   : > { %193 = sbr.rel (%p190_p9) target bundleno = 560 (0x230), region = 40  ;;  %s634_s11 = sshll.u32 (!%p190_p9), %s213_s10, 4 }
   0xf   : > { %s642_s14 = sshll.u32 (!%p190_p9), %s852_s22, 7  ;;  %s797_s25 = smov (!%p190_p9), [#allocation2]  }
  0x10   : > { %s935_s17 = scalar_lea.hbm (!%p190_p9), %s982_s5, %s642_s14  ;;  %s737_s26 = sshll.u32 (!%p190_p9), %s797_s25, 4  ;;  %s738_s26 = int_to_ptr.vmem [resolvable:$false] %s737_s26 }
  0x11   : > { %s739_s30 = scalar_lea.vmem (!%p190_p9), %s738_s26, 512 }
  0x13   : > { %v221_v0 = vld [vmem:[%s978_s1] sm:$0xff]  ;;  %vm264_vm0 = vcmask 64512   ;;  %v795_v2 = vmov 0   ;;  %s217_s9 = scalar_select %p216_p10, %s852_s22, 2  ;;  %v224_v3 = vld [vmem:[%s979_s2 + $0x8] sm:$0xff]  ;;  %v229_v25 = vlaneseq  ;;  %v796_v57 = vmov 0.0  }
  0x14   : > { %v223_v1 = vld [vmem:[%s979_s2] sm:$0xff]  ;;  %650 = vmatprep.mubr.msk.f32.mxu0 %vm264_vm0, %v221_v0  ;;  %697 = vset.pattern.permute.xlu0 %v795_v2  ;;  %v222_v5 = vld [vmem:[%s978_s1 + $0x8] sm:$0xff]  ;;  %s937_s22 = scalar_lea.sflag [#allocation3], %s213_s10 }
  0x15   : > { %382 = vperm.xlu0 %697, %v223_v1   ;;  %698 = vset.pattern.permute.xlu1 %v795_v2  ;;  %s635_s12 = sshll.u32 %s217_s9, 3  ;;  %v227_v6 = vld [vmem:[%s981_s4] sm:$0xff]  ;;  %v901_v27 = vshrl.u32 %v229_v25, 7  ;;  %v226_v34 = vld [vmem:[%s980_s3 + $0x8] sm:$0xff] }
  0x16   : > { %s219_s15 = scalar_lea.vmem %s977_s0, %s635_s12  ;;  %v225_v32 = vld [vmem:[%s980_s3] sm:$0xff]  ;;  %v228_v37 = vld [vmem:[%s981_s4 + $0x8] sm:$0xff]  ;;  %s215_s12 = scalar_lea.vmem [#allocation2], %s634_s11 }
  0x17   : > { %v220_v4 = vld [vmem:[%s219_s15] sm:$0xff]  ;;  %v348_v31 = vsub.s32 0, %v901_v27  ;;  %501 = vperm.xlu1 %698, %v225_v32   ;;  %vm232_vm3 = vcmp.gt.s32.totalorder %v901_v27, 0  ;;  %s568_s13 = sshll.u32 %s215_s12, 4  ;;  %s930_s13 = int_to_ptr.vmem [resolvable:$true] %s568_s13 }
  0x18   : > { %648 = vmatprep.subr.mxu0 %v220_v4  ;;  %v248_v7 = vmax.f32 %v220_v4, 1.0000001  ;;  %v240_v10 = vmul.f32 %v220_v4, %v220_v4  ;;  %v916_v58 = vsel %vm232_vm3, 1.0, %v796_v57  ;;  %s733_s23 = scalar_lea.vmem %s930_s13, 256  ;;  %p740_p0 = scmp.lt.s32.totalorder %s930_s13, %s738_s26 }
  0x19   : > { %387 = vperm.xlu0 %697, %v224_v3   ;;  %649 = vmatpush3.msra.mxu0 %v220_v4  ;;  %v919_v61 = vsub.f32 1.0, %v916_v58  ;;  %p734_p11 = scmp.ne.s32.totalorder %s930_s13, %s733_s23  ;;  %p741_p1 = scmp.lt.s32.totalorder %s739_s30, %s733_s23 }
  0x1a   : > { %651 = vmatmul.mubr.msk.f32.vlgmr.msra.gmra.mxu0 %vm264_vm0, %v222_v5  ;;  %v249_v8 = vmul.f32 %v248_v7, %v248_v7  ;;  %v241_v11 = vrot.slane %v240_v10, 4 }
  0x1b   : > { %506 = vperm.xlu1 %698, %v226_v34   ;;  %p735_p12 = pnand %p734_p11, %p869_p5  ;;  %p742_p2 = por %p741_p1, %p740_p0 }
  0x1c   : > { %v637_v9 = vadd.f32 -1.0, %v249_v8  ;;  %v242_v12 = vadd.f32 %v241_v11, %v240_v10 }
  0x1d   : > { %513 = vperm.xlu0 %697, %v227_v6   ;;  %p736_p13 = pneg %p735_p12 }
  0x1e   : > { %699 = vrsqrt.f32 %v637_v9  ;;  %v243_v13 = vrot.slane %v242_v12, 2  ;;  %vm253_vm1 = vcmp.eq.f32.partialorder %v637_v9, inf  ;;  %v256_v18 = vand.u32 2147483648, %v637_v9 }
  0x1f   : > { %vm255_vm2 = vcmp.eq.f32.partialorder %v637_v9, 0.0  ;;  %518 = vperm.xlu1 %698, %v228_v37   ;;  %p743_p3 = pnand %p742_p2, %p736_p13 }
  0x20   : > { %v244_v15 = vadd.f32 %v243_v13, %v242_v12 }
  0x22   : > { %v245_v17 = vrot.slane %v244_v15, 1 }
  0x24   : > { %v246_v20 = vadd.f32 %v245_v17, %v244_v15 }
  0x26   : > { %v247_v22 = vsub.f32 %v246_v20, %v240_v10 }
  0x28   : > { %v261_v24 = vmax.f32 %v247_v22, 1e-14 }
  0x2b   : > { %v700_v14 = vpop.eup %699 }
  0x2c   : > { %v252_v16 = vmul.f32 %v700_v14, %v637_v9 }
  0x2e   : > { %v254_v19 = vsel %vm253_vm1, %v637_v9, %v252_v16 }
  0x2f   : > { %v257_v21 = vsel %vm255_vm2, %v256_v18, %v254_v19 }
  0x30   : > { %v258_v23 = vadd.f32 %v257_v21, %v248_v7 }
  0x32   : > { %701 = vlog2.f32 %v258_v23 }
  0x33   : > { %703 = vrsqrt.f32 %v261_v24 }
  0x3f   : > { %v702_v26 = vpop.eup %701 }
  0x40   : > { %v260_v28 = vmul.f32 0.6931472, %v702_v26  ;;  %v704_v29 = vpop.eup %703 }
  0x42   : > { %v263_v30 = vmul.f32 %v704_v29, %v260_v28 }
  0x44   : > { %v349_v33 = vrot.slane %v263_v30, %v348_v31 }
  0x90   : > { %v383_v0 = vpop.permute.xlu0 %382 }
  0x94   : > { %v388_v9 = vpop.permute.xlu0 %387 }
  0xda   : > { %v652_v35 = vpop.f32.mrf.mxu0 }
  0xdb   : > { %v351_v36 = vmul.f32 %v652_v35, %v349_v33 }
  0xdc   : > { %v337_v38 = vpop.f32.mrf.mxu0 }
  0xdd   : > { %v350_v39 = vmul.f32 %v349_v33, %v337_v38  ;;  %v353_v40 = vmul.f32 %v351_v36, %v351_v36 }
  0xdf   : > { %v352_v41 = vmul.f32 %v350_v39, %v350_v39 }
  0xe1   : > { %v354_v42 = vadd.f32 %v353_v40, %v352_v41 }
  0xe3   : > { %v355_v43 = vrot.slane %v354_v42, 4 }
  0xe5   : > { %v356_v44 = vadd.f32 %v355_v43, %v354_v42 }
  0xe7   : > { %v357_v45 = vrot.slane %v356_v44, 2 }
  0xe9   : > { %v358_v46 = vadd.f32 %v357_v45, %v356_v44 }
  0xeb   : > { %v359_v47 = vrot.slane %v358_v46, 1 }
  0xed   : > { %v360_v48 = vadd.f32 %v359_v47, %v358_v46 }
  0xef   : > { %v361_v49 = vmax.f32 %v360_v48, 1e-14 }
  0xf1   : > { %705 = vrsqrt.f32 %v361_v49 }
  0xfe   : > { %v706_v50 = vpop.eup %705 }
  0xff   : > { %v363_v51 = vmul.f32 %v706_v50, %v360_v48 }
 0x101   : > { %v364_v52 = vmul.f32 1.442695, %v363_v51  ;;  %v366_v53 = vsub.f32 0.0, %v363_v51 }
 0x103   : > { %v367_v54 = vmul.f32 1.442695, %v366_v53  ;;  %707 = vpow2.f32 %v364_v52 }
 0x105   : > { %709 = vpow2.f32 %v367_v54 }
 0x110   : > { %v708_v55 = vpop.eup %707 }
 0x112   : > { %v710_v56 = vpop.eup %709 }
 0x113   : > { %v369_v59 = vadd.f32 %v710_v56, %v708_v55  ;;  %v371_v60 = vsub.f32 %v708_v55, %v710_v56 }
 0x115   : > { %v370_v62 = vmul.f32 0.5, %v369_v59  ;;  %v372_v63 = vmul.f32 0.5, %v371_v60 }
 0x117   : > { %v375_v1 = vmul.f32 %v706_v50, %v372_v63  ;;  %v373_v2 = vmul.f32 %v370_v62, %v919_v61  ;;  %v374_v5 = vmul.f32 0.0, %v370_v62  ;;  %v399_v7 = vadd.f32 1.0, %v370_v62 }
 0x119   : > { %v376_v3 = vmul.f32 %v375_v1, %v350_v39  ;;  %v377_v4 = vmul.f32 %v375_v1, %v351_v36  ;;  %711 = vrcp.f32 %v399_v7 }
 0x11b   : > { %v378_v6 = vadd.f32 %v376_v3, %v373_v2  ;;  %v379_v8 = vadd.f32 %v377_v4, %v374_v5 }
 0x11d   : > { %v390_v10 = vmul.f32 %v383_v0, %v378_v6  ;;  %v391_v11 = vmul.f32 %v388_v9, %v379_v8  ;;  %v402_v20 = vadd.f32 %v378_v6, %v919_v61 }
 0x11f   : > { %v392_v12 = vadd.f32 %v391_v11, %v390_v10 }
 0x121   : > { %v393_v13 = vrot.slane %v392_v12, 4 }
 0x123   : > { %v394_v14 = vadd.f32 %v393_v13, %v392_v12 }
 0x125   : > { %v395_v15 = vrot.slane %v394_v14, 2 }
 0x126   : > { %v712_v19 = vpop.eup %711 }
 0x127   : > { %v396_v16 = vadd.f32 %v395_v15, %v394_v14 }
 0x129   : > { %v397_v17 = vrot.slane %v396_v16, 1 }
 0x12b   : > { %v398_v18 = vadd.f32 %v397_v17, %v396_v16 }
 0x12d   : > { %v401_v21 = vmul.f32 %v712_v19, %v398_v18  ;;  %v417_v35 = vmul.f32 2.0, %v398_v18 }
 0x12f   : > { %v404_v22 = vmul.f32 %v402_v20, %v401_v21  ;;  %v405_v23 = vmul.f32 %v401_v21, %v379_v8  ;;  %v418_v38 = vmul.f32 %v417_v35, %v398_v18 }
 0x131   : > { %v406_v24 = vadd.f32 %v404_v22, %v383_v0  ;;  %v407_v25 = vadd.f32 %v405_v23, %v388_v9 }
 0x133   : > { %v408_v26 = vmul.f32 %v406_v24, %v406_v24  ;;  %v409_v28 = vmul.f32 %v407_v25, %v407_v25 }
 0x135   : > { %v410_v29 = vadd.f32 %v409_v28, %v408_v26 }
 0x137   : > { %v411_v30 = vrot.slane %v410_v29, 4 }
 0x139   : > { %v412_v32 = vadd.f32 %v411_v30, %v410_v29 }
 0x13b   : > { %v413_v33 = vrot.slane %v412_v32, 2 }
 0x13d   : > { %v414_v34 = vadd.f32 %v413_v33, %v412_v32 }
 0x13f   : > { %v415_v36 = vrot.slane %v414_v34, 1 }
 0x141   : > { %v416_v37 = vadd.f32 %v415_v36, %v414_v34 }
 0x143   : > { %v419_v39 = vsub.f32 %v416_v37, %v418_v38 }
 0x145   : > { %v420_v40 = vmax.f32 %v419_v39, 0.0 }
 0x147   : > { %v421_v41 = vmax.f32 %v420_v40, 1e-14 }
 0x149   : > { %713 = vrsqrt.f32 %v421_v41 }
 0x156   : > { %v714_v42 = vpop.eup %713 }
 0x157   : > { %v423_v43 = vmul.f32 %v714_v42, %v420_v40 }
 0x159   : > { %v424_v44 = vmul.f32 1.442695, %v423_v43  ;;  %v426_v45 = vsub.f32 0.0, %v423_v43 }
 0x15b   : > { %v427_v46 = vmul.f32 1.442695, %v426_v45  ;;  %715 = vpow2.f32 %v424_v44 }
 0x15d   : > { %717 = vpow2.f32 %v427_v46 }
 0x168   : > { %v716_v47 = vpop.eup %715 }
 0x16a   : > { %v718_v48 = vpop.eup %717 }
 0x16b   : > { %v429_v49 = vadd.f32 %v718_v48, %v716_v47  ;;  %v431_v50 = vsub.f32 %v716_v47, %v718_v48  ;;  %v502_v47 = vpop.permute.xlu1 %501 }
 0x16d   : > { %v430_v51 = vmul.f32 0.5, %v429_v49  ;;  %v432_v52 = vmul.f32 0.5, %v431_v50 }
 0x16f   : > { %v435_v53 = vmul.f32 %v714_v42, %v432_v52  ;;  %v433_v54 = vmul.f32 %v430_v51, %v378_v6  ;;  %v434_v55 = vmul.f32 %v430_v51, %v379_v8  ;;  %v507_v48 = vpop.permute.xlu1 %506 }
 0x171   : > { %v436_v56 = vmul.f32 %v435_v53, %v406_v24  ;;  %v437_v57 = vmul.f32 %v435_v53, %v407_v25 }
 0x173   : > { %v438_v59 = vadd.f32 %v436_v56, %v433_v54  ;;  %v439_v60 = vadd.f32 %v437_v57, %v434_v55  ;;  %v519_v54 = vpop.permute.xlu1 %518 }
 0x175   : > { %v440_v62 = vmul.f32 %v916_v58, %v438_v59  ;;  %v451_v63 = vmax.f32 %v438_v59, 1.0000001  ;;  %v443_v1 = vmul.f32 %v439_v60, %v439_v60 }
 0x177   : > { %v442_v0 = vmul.f32 %v440_v62, %v440_v62  ;;  %v452_v2 = vmul.f32 %v451_v63, %v451_v63 }
 0x179   : > { %v444_v3 = vadd.f32 %v443_v1, %v442_v0  ;;  %v640_v4 = vadd.f32 -1.0, %v452_v2 }
 0x17b   : > { %v445_v5 = vrot.slane %v444_v3, 4  ;;  %719 = vrsqrt.f32 %v640_v4  ;;  %vm456_vm4 = vcmp.eq.f32.partialorder %v640_v4, inf  ;;  %v459_v13 = vand.u32 2147483648, %v640_v4 }
 0x17c   : > { %vm458_vm5 = vcmp.eq.f32.partialorder %v640_v4, 0.0 }
 0x17d   : > { %v446_v7 = vadd.f32 %v445_v5, %v444_v3 }
 0x17f   : > { %v447_v9 = vrot.slane %v446_v7, 2 }
 0x181   : > { %v448_v10 = vadd.f32 %v447_v9, %v446_v7 }
 0x183   : > { %v449_v11 = vrot.slane %v448_v10, 1 }
 0x185   : > { %v450_v8 = vadd.f32 %v449_v11, %v448_v10 }
 0x187   : > { %v464_v17 = vmax.f32 %v450_v8, 1e-14 }
 0x188   : > { %v720_v6 = vpop.eup %719 }
 0x189   : > { %v455_v12 = vmul.f32 %v720_v6, %v640_v4 }
 0x18b   : > { %v457_v14 = vsel %vm456_vm4, %v640_v4, %v455_v12 }
 0x18c   : > { %v460_v15 = vsel %vm458_vm5, %v459_v13, %v457_v14 }
 0x18d   : > { %v461_v16 = vadd.f32 %v460_v15, %v451_v63 }
 0x18f   : > { %721 = vlog2.f32 %v461_v16 }
 0x190   : > { %723 = vrsqrt.f32 %v464_v17 }
 0x19c   : > { %v722_v18 = vpop.eup %721 }
 0x19d   : > { %v463_v19 = vmul.f32 0.6931472, %v722_v18  ;;  %v724_v20 = vpop.eup %723 }
 0x19f   : > { %v466_v21 = vmul.f32 %v724_v20, %v463_v19 }
 0x1a1   : > { %v470_v22 = vrot.slane %v466_v21, %v348_v31 }
 0x1a3   : > { %v471_v23 = vmul.f32 %v470_v22, %v440_v62  ;;  %v472_v24 = vmul.f32 %v470_v22, %v439_v60 }
 0x1a5   : > { %v473_v25 = vadd.f32 %v472_v24, %v471_v23 }
 0x1a7   : > { %v474_v26 = vrot.slane %v473_v25, 4 }
 0x1a9   : > { %v475_v28 = vadd.f32 %v474_v26, %v473_v25 }
 0x1ab   : > { %v476_v29 = vrot.slane %v475_v28, 2 }
 0x1ad   : > { %v477_v30 = vadd.f32 %v476_v29, %v475_v28 }
 0x1af   : > { %v478_v32 = vrot.slane %v477_v30, 1 }
 0x1b1   : > { %v479_v33 = vadd.f32 %v478_v32, %v477_v30 }
 0x1b3   : > { %v480_v34 = vmul.f32 0.06666667, %v479_v33 }
 0x1b5   : > { %v482_v35 = vsub.f32 %v472_v24, %v480_v34  ;;  %v481_v36 = vsub.f32 %v471_v23, %v480_v34 }
 0x1b7   : > { %v483_v37 = vmul.f32 %v916_v58, %v481_v36  ;;  %v486_v39 = vmul.f32 %v482_v35, %v482_v35  ;;  %v514_v58 = vpop.permute.xlu0 %513 }
 0x1b9   : > { %v485_v38 = vmul.f32 %v483_v37, %v483_v37 }
 0x1bb   : > { %v487_v40 = vadd.f32 %v486_v39, %v485_v38 }
 0x1bd   : > { %v488_v41 = vrot.slane %v487_v40, 4 }
 0x1bf   : > { %v489_v27 = vadd.f32 %v488_v41, %v487_v40 }
 0x1c1   : > { %v490_v31 = vrot.slane %v489_v27, 2 }
 0x1c3   : > { %v491_v42 = vadd.f32 %v490_v31, %v489_v27 }
 0x1c5   : > { %v492_v43 = vrot.slane %v491_v42, 1 }
 0x1c7   : > { %v493_v44 = vadd.f32 %v492_v43, %v491_v42 }
 0x1c9   : > { %v494_v45 = vmul.f32 0.06666667, %v493_v44 }
 0x1cb   : > { %v495_v46 = vadd.f32 1e-05, %v494_v45 }
 0x1cd   : > { %725 = vrsqrt.f32 %v495_v46 }
 0x1da   : > { %v726_v49 = vpop.eup %725 }
 0x1db   : > { %v497_v50 = vmul.f32 %v726_v49, %v483_v37  ;;  %v498_v51 = vmul.f32 %v726_v49, %v482_v35 }
 0x1dd   : > { %v509_v52 = vmul.f32 %v502_v47, %v497_v50  ;;  %v510_v53 = vmul.f32 %v507_v48, %v498_v51 }
 0x1df   : > { %v521_v55 = vadd.f32 %v514_v58, %v509_v52  ;;  %v522_v56 = vadd.f32 %v519_v54, %v510_v53 }
 0x1e1   : > { %v523_v57 = vmax.f32 %v521_v55, 0.0  ;;  %v524_v59 = vmax.f32 %v522_v56, 0.0 }
 0x1e3   : > { %v525_v60 = vmul.f32 %v523_v57, %v523_v57  ;;  %v526_v62 = vmul.f32 %v524_v59, %v524_v59 }
 0x1e5   : > { %v527_v63 = vadd.f32 %v526_v62, %v525_v60 }
 0x1e7   : > { %v528_v0 = vrot.slane %v527_v63, 4 }
 0x1e9   : > { %v529_v1 = vadd.f32 %v528_v0, %v527_v63 }
 0x1eb   : > { %v530_v2 = vrot.slane %v529_v1, 2 }
 0x1ed   : > { %v531_v3 = vadd.f32 %v530_v2, %v529_v1 }
 0x1ef   : > { %v532_v4 = vrot.slane %v531_v3, 1 }
 0x1f1   : > { %v533_v5 = vadd.f32 %v532_v4, %v531_v3 }
 0x1f3   : > { %v534_v7 = vmax.f32 %v533_v5, 1e-14 }
 0x1f5   : > { %727 = vrsqrt.f32 %v534_v7 }
 0x202   : > { %v728_v9 = vpop.eup %727 }
 0x203   : > { %v536_v10 = vmul.f32 %v728_v9, %v533_v5 }
 0x205   : > { %v537_v11 = vmul.f32 1.442695, %v536_v10  ;;  %v539_v6 = vsub.f32 0.0, %v536_v10 }
 0x207   : > { %v540_v8 = vmul.f32 1.442695, %v539_v6  ;;  %729 = vpow2.f32 %v537_v11 }
 0x209   : > { %731 = vpow2.f32 %v540_v8 }
 0x214   : > { %v730_v12 = vpop.eup %729 }
 0x216   : > { %v732_v13 = vpop.eup %731 }
 0x217   : > { %v542_v14 = vadd.f32 %v732_v13, %v730_v12  ;;  %v544_v15 = vsub.f32 %v730_v12, %v732_v13 }
 0x219   : > { %v543_v16 = vmul.f32 0.5, %v542_v14  ;;  %v545_v17 = vmul.f32 0.5, %v544_v15 }
 0x21b   : > { %v548_v18 = vmul.f32 %v728_v9, %v545_v17  ;;  %v546_v19 = vmul.f32 %v543_v16, %v919_v61  ;;  %v547_v20 = vmul.f32 0.0, %v543_v16 }
 0x21d   : > { %v549_v21 = vmul.f32 %v548_v18, %v523_v57  ;;  %v550_v22 = vmul.f32 %v548_v18, %v524_v59 }
 0x21f   : > { %v551_v23 = vadd.f32 %v549_v21, %v546_v19  ;;  %v552_v24 = vadd.f32 %v550_v22, %v547_v20 }
 0x221   : > { %553 = vst [vmem:[%s215_s12] sm:$0xff] %v551_v23  ;;  %554 = vst [vmem:[%s215_s12 + $0x8] sm:$0xff] %v552_v24 }
 0x222   : > { %746 = shalt.err (!%p743_p3)
}
 0x223   : > { %s747_s6 = scalar_lea.hbm %s935_s17, 256  ;;  %s751_s9 = scalar_lea.hbm %s982_s5, 768 }
 0x224   : > { %p748_p4 = scmp.ne.s32.totalorder %s935_s17, %s747_s6  ;;  %p752_p9 = scmp.lt.s32.totalorder %s935_s17, %s982_s5 }
 0x225   : > { %p753_p10 = scmp.lt.s32.totalorder %s751_s9, %s747_s6 }
 0x226   : > { %p749_p7 = pnand %p748_p4, %p869_p5 }
 0x227   : > { %p754_p11 = por %p753_p10, %p752_p9 }
 0x228   : > { %p750_p8 = pneg %p749_p7 }
 0x22a   : > { %p755_p12 = pnand %p754_p11, %p750_p8 }
 0x22c   : > { %758 = shalt.err (!%p755_p12)
}
 0x22d   : > { %s798_s12 = smov 128   ;;  %s799_s14 = smov 384  }
 0x22e   : > { %s800_s15 = smov 8  }
 0x22f   : > { %653 = dma.vmem_to_hbm [thread:$0]  (%p869_p5), %s930_s13, 256, %s935_s17, %s937_s22, %s798_s12, %s799_s14, %s800_s15  }
 0x230 PF: > { %p659_p13 = scmp.ge.s32.totalorder %s793_s21, 2  ;;  %s583_s16 = sand.u32 1, %s781_s18  }
 0x231   : > { %s584_s23 = scalar_lea.sflag [#allocation3], %s583_s16 }
 0x232   : > { %p656_p0 = pnand %p659_p13, %p873_p6 }
 0x234   : > { %p657_p1 = pneg %p656_p0 }
 0x236   : > { %776 = dma.done.wait (%p657_p1), %s584_s23, 256  }
 0x237   : > { %778 = vsyncadd (%p657_p1), %s584_s23, 4294967040  ;;  %p15_p2 = scmp.ge.s32.totalorder %s856_s24, 5   ;;  %s985_s18 = smov %s785_s19 }
 0x238   : > { %s986_s19 = smov %s789_s20  ;;  %s987_s20 = smov %s867_s27 }
 0x239   : > { %s988_s21 = smov %s856_s24  ;;  %17 = sbr.rel (!%p15_p2) target bundleno = 3 (0x3), region = 75 }
 0x23e   :  { %589 = vsyncpa [#allocation3], 1 }
 0x23f   :  { %591 = vsyncpa [#allocation3 + $0x1], 1 }

</bundles_post_ra>
